<compile_context>
chip_gen: v5e
topology: v5e:2x2
jax: 0.10.0
libtpu: 0.0.40
codegen_flags: <defaults>
</compile_context>

<pallas_src>
import numpy as np
import jax
import jax.numpy as jnp
from jax.experimental import pallas as pl
from jax.experimental.pallas import tpu as pltpu

# ----------------------------------------------------------------------------
# Deterministic "parameter" init, matching GradientLoss.__init__:
# (img_channels, 1, 3, 3) buffer, every channel is the Laplacian stencil.
# ----------------------------------------------------------------------------
_LAPLACIAN_3x3 = np.array([[0.0, 1.0, 0.0],
                           [1.0, -4.0, 1.0],
                           [0.0, 1.0, 0.0]], dtype=np.float32)


def make_gradient_kernel_buffer(img_channels: int) -> np.ndarray:
    k = _LAPLACIAN_3x3.reshape(1, 1, 3, 3)
    return np.concatenate([k] * img_channels, axis=0)  # (C, 1, 3, 3)


# ----------------------------------------------------------------------------
# Pallas kernel: one block of Bn images x C channels. Computes
#   sum(|conv3x3(full - target, padding=1) * mask|)
# for the block and writes the scalar (splatted into a lane-dense (1,8,128)
# block) to its own output slot. The Laplacian taps are baked in: the buffer is
# fixed (non-learnable) and identical for every channel by construction, and
# the conv is depthwise, so grad(a) - grad(b) == grad(a - b).
# ----------------------------------------------------------------------------
def _grad_l1_block_kernel(full_ref, targ_ref, mask_ref, out_ref):
    Bn, C, H, W = full_ref.shape

    d = full_ref[...].astype(jnp.float32) - targ_ref[...].astype(jnp.float32)
    m = mask_ref[...].astype(jnp.float32)             # (Bn, 1, H, W)

    zrow = jnp.zeros((Bn, C, 1, W), jnp.float32)
    zcol = jnp.zeros((Bn, C, H, 1), jnp.float32)

    # conv2d(d, laplacian, padding=1): -4*center + 4 axis-aligned neighbours,
    # out-of-bounds neighbours are zero. Sequential adds keep live temps small.
    # TODO(synk): the dx = +/-1 lane shifts could use pltpu.roll + border mask
    # (XLU slot) instead of slice+concat; kept slice+concat for robustness.
    acc = (-4.0) * d
    acc = acc + jnp.concatenate([zrow, d[:, :, :H - 1, :]], axis=2)   # up
    acc = acc + jnp.concatenate([d[:, :, 1:, :], zrow], axis=2)       # down
    acc = acc + jnp.concatenate([zcol, d[:, :, :, :W - 1]], axis=3)   # left
    acc = acc + jnp.concatenate([d[:, :, :, 1:], zcol], axis=3)       # right

    total = jnp.sum(jnp.abs(acc * m))                 # mask broadcasts over C
    out_ref[...] = jnp.full(out_ref.shape, total, dtype=jnp.float32)


def _largest_divisor_at_most(n: int, cap: int) -> int:
    cap = max(1, min(n, cap))
    for d in range(cap, 0, -1):
        if n % d == 0:
            return d
    return 1


def gradient_l1_mean(full, target_r, mask_r):
    """L1Loss(grad(full)*mask, grad(target_r)*mask) with 'mean' reduction."""
    N, C, H, W = full.shape
    itemsize = full.dtype.itemsize
    # Target ~1 MiB per input per grid step so double-buffered inputs plus the
    # in-kernel stencil temporaries fit comfortably in scoped VMEM on all of
    # v5e (16 MiB default), v6e (32 MiB) and v7x (64 MiB physical).
    per_image_bytes = C * H * W * itemsize
    bn_cap = max(1, (1 << 20) // max(per_image_bytes, 1))
    Bn = _largest_divisor_at_most(N, bn_cap)
    num_blocks = N // Bn

    partials = pl.pallas_call(
        _grad_l1_block_kernel,
        out_shape=jax.ShapeDtypeStruct((num_blocks, 8, 128), jnp.float32),
        grid=(num_blocks,),
        in_specs=[
            pl.BlockSpec((Bn, C, H, W), lambda i: (i, 0, 0, 0)),   # full
            pl.BlockSpec((Bn, C, H, W), lambda i: (i, 0, 0, 0)),   # target
            pl.BlockSpec((Bn, 1, H, W), lambda i: (i, 0, 0, 0)),   # mask (no C bcast)
        ],
        out_specs=pl.BlockSpec((1, 8, 128), lambda i: (i, 0, 0)),
        compiler_params=pltpu.CompilerParams(
            dimension_semantics=("parallel",),
            vmem_limit_bytes=48 * 1024 * 1024),
    )(full, target_r, mask_r)

    return jnp.sum(partials[:, 0, 0]) / (N * C * H * W)


# ----------------------------------------------------------------------------
# Glue matching GradientLoss.forward
# ----------------------------------------------------------------------------
def resize_like(x, like):
    # TODO(synk): `resize_like` is not defined in the reference source; assumed
    # to be an F.interpolate-style spatial resize to `like`'s H/W (bilinear
    # here; switch method to "nearest" if the reference uses the torch default).
    N, C, H, W = x.shape
    Ht, Wt = like.shape[2], like.shape[3]
    if (H, W) == (Ht, Wt):
        return x
    return jax.image.resize(x, (N, C, Ht, Wt), method="bilinear")


def gradient_loss(fulls, target, mask, img_channels=3):
    # Registered buffer parity: every channel carries the same stencil, which
    # is exactly what lets the kernel bake the taps in.
    kernel_buffer = make_gradient_kernel_buffer(img_channels)  # (C,1,3,3)
    assert np.all(kernel_buffer == kernel_buffer[0:1])

    loss = jnp.float32(0.0)
    for full in fulls:
        mask_resize = resize_like(mask, full)
        target_resize = resize_like(target, full)
        loss = loss + gradient_l1_mean(full, target_resize, mask_resize)
    return loss / len(fulls)


if __name__ == "__main__":
    key = jax.random.PRNGKey(0)
    k1, k2, k3, k4 = jax.random.split(key, 4)

    N, C, H, W = 2, 3, 16, 16
    target = jax.random.normal(k1, (N, C, H, W), dtype=jnp.float32)
    mask = (jax.random.uniform(k2, (N, 1, H, W)) > 0.5).astype(jnp.float32)
    # multi-scale predictions, as the `fulls` list implies
    fulls = [
        jax.random.normal(k3, (N, C, H, W), dtype=jnp.float32),
        jax.random.normal(k4, (N, C, H // 2, W // 2), dtype=jnp.float32),
    ]

    loss = gradient_loss(fulls, target, mask, img_channels=C)
    jax.block_until_ready(loss)
    print("KERNEL_OK")
</pallas_src>

<mosaic_0001>
module attributes {stable_mosaic.version = 11 : i64} {
  func.func @_grad_l1_block_kernel(%arg0: i32, %arg1: memref<2x3x16x16xf32, #tpu.memory_space<vmem>>, %arg2: memref<2x3x16x16xf32, #tpu.memory_space<vmem>>, %arg3: memref<2x1x16x16xf32, #tpu.memory_space<vmem>>, %arg4: memref<1x8x128xf32, #tpu.memory_space<vmem>>) attributes {dimension_semantics = [#tpu.dimension_semantics<parallel>], iteration_bounds = array<i64: 1>, scalar_prefetch = 0 : i64, scratch_operands = 0 : i64, tpu.core_type = #tpu.core_type<tc>, window_params = [{transform_indices = @transform_0, window_bounds = array<i64: 2, 3, 16, 16>}, {transform_indices = @transform_1, window_bounds = array<i64: 2, 3, 16, 16>}, {transform_indices = @transform_2, window_bounds = array<i64: 2, 1, 16, 16>}, {transform_indices = @transform_3, window_bounds = array<i64: 1, 8, 128>}]} {
    %c0 = arith.constant 0 : index
    %c0_0 = arith.constant 0 : index
    %c0_1 = arith.constant 0 : index
    %c0_2 = arith.constant 0 : index
    %0 = vector.load %arg1[%c0, %c0_0, %c0_1, %c0_2] : memref<2x3x16x16xf32, #tpu.memory_space<vmem>>, vector<2x3x16x16xf32>
    %c0_3 = arith.constant 0 : index
    %c0_4 = arith.constant 0 : index
    %c0_5 = arith.constant 0 : index
    %c0_6 = arith.constant 0 : index
    %1 = vector.load %arg2[%c0_3, %c0_4, %c0_5, %c0_6] : memref<2x3x16x16xf32, #tpu.memory_space<vmem>>, vector<2x3x16x16xf32>
    %2 = arith.subf %0, %1 : vector<2x3x16x16xf32>
    %c0_7 = arith.constant 0 : index
    %c0_8 = arith.constant 0 : index
    %c0_9 = arith.constant 0 : index
    %c0_10 = arith.constant 0 : index
    %3 = vector.load %arg3[%c0_7, %c0_8, %c0_9, %c0_10] : memref<2x1x16x16xf32, #tpu.memory_space<vmem>>, vector<2x1x16x16xf32>
    %cst = arith.constant 0.000000e+00 : f32
    %4 = vector.broadcast %cst : f32 to vector<2x3x1x16xf32>
    %cst_11 = arith.constant 0.000000e+00 : f32
    %5 = vector.broadcast %cst_11 : f32 to vector<2x3x16x1xf32>
    %cst_12 = arith.constant -4.000000e+00 : f32
    %6 = vector.broadcast %cst_12 : f32 to vector<2x3x16x16xf32>
    %7 = arith.mulf %6, %2 : vector<2x3x16x16xf32>
    %8 = vector.extract_strided_slice %2 {offsets = [0, 0, 0, 0], sizes = [2, 3, 15, 16], strides = [1, 1, 1, 1]} : vector<2x3x16x16xf32> to vector<2x3x15x16xf32>
    %9 = tpu.concatenate %4, %8 in 2 : vector<2x3x1x16xf32>, vector<2x3x15x16xf32> -> vector<2x3x16x16xf32>
    %10 = arith.addf %7, %9 : vector<2x3x16x16xf32>
    %11 = vector.extract_strided_slice %2 {offsets = [0, 0, 1, 0], sizes = [2, 3, 15, 16], strides = [1, 1, 1, 1]} : vector<2x3x16x16xf32> to vector<2x3x15x16xf32>
    %12 = tpu.concatenate %11, %4 in 2 : vector<2x3x15x16xf32>, vector<2x3x1x16xf32> -> vector<2x3x16x16xf32>
    %13 = arith.addf %10, %12 : vector<2x3x16x16xf32>
    %14 = vector.extract_strided_slice %2 {offsets = [0, 0, 0, 0], sizes = [2, 3, 16, 15], strides = [1, 1, 1, 1]} : vector<2x3x16x16xf32> to vector<2x3x16x15xf32>
    %15 = tpu.concatenate %5, %14 in 3 : vector<2x3x16x1xf32>, vector<2x3x16x15xf32> -> vector<2x3x16x16xf32>
    %16 = arith.addf %13, %15 : vector<2x3x16x16xf32>
    %17 = vector.extract_strided_slice %2 {offsets = [0, 0, 0, 1], sizes = [2, 3, 16, 15], strides = [1, 1, 1, 1]} : vector<2x3x16x16xf32> to vector<2x3x16x15xf32>
    %18 = tpu.concatenate %17, %5 in 3 : vector<2x3x16x15xf32>, vector<2x3x16x1xf32> -> vector<2x3x16x16xf32>
    %19 = arith.addf %16, %18 : vector<2x3x16x16xf32>
    %20 = vector.broadcast %3 : vector<2x1x16x16xf32> to vector<2x3x16x16xf32>
    %21 = arith.mulf %19, %20 : vector<2x3x16x16xf32>
    %22 = math.absf %21 : vector<2x3x16x16xf32>
    %23 = vector.shape_cast %22 : vector<2x3x16x16xf32> to vector<1x2x3x16x16xf32>
    %cst_13 = arith.constant dense<0.000000e+00> : vector<1xf32>
    %24 = vector.multi_reduction <add>, %23, %cst_13 [1, 2, 3, 4] : vector<1x2x3x16x16xf32> to vector<1xf32>
    %25 = vector.shape_cast %24 : vector<1xf32> to vector<1x1x1x1x1xf32>
    %26 = vector.extract %25[0, 0, 0, 0, 0] : f32 from vector<1x1x1x1x1xf32>
    %27 = vector.broadcast %26 : f32 to vector<1x8x128xf32>
    %c0_14 = arith.constant 0 : index
    %c0_15 = arith.constant 0 : index
    %c0_16 = arith.constant 0 : index
    %28 = vector.load %arg4[%c0_14, %c0_15, %c0_16] : memref<1x8x128xf32, #tpu.memory_space<vmem>>, vector<1x8x128xf32>
    tpu.vector_store %arg4[%c0_14, %c0_15, %c0_16], %27 {strides = array<i32>} : memref<1x8x128xf32, #tpu.memory_space<vmem>>, vector<1x8x128xf32>,
    return
  }
  func.func @transform_0(%arg0: i32) -> (i32, i32, i32, i32) {
    %c0_i32 = arith.constant 0 : i32
    %c0_i32_0 = arith.constant 0 : i32
    %c0_i32_1 = arith.constant 0 : i32
    %c0_i32_2 = arith.constant 0 : i32
    return %arg0, %c0_i32, %c0_i32_0, %c0_i32_1 : i32, i32, i32, i32
  }
  func.func @transform_1(%arg0: i32) -> (i32, i32, i32, i32) {
    %c0_i32 = arith.constant 0 : i32
    %c0_i32_0 = arith.constant 0 : i32
    %c0_i32_1 = arith.constant 0 : i32
    %c0_i32_2 = arith.constant 0 : i32
    return %arg0, %c0_i32, %c0_i32_0, %c0_i32_1 : i32, i32, i32, i32
  }
  func.func @transform_2(%arg0: i32) -> (i32, i32, i32, i32) {
    %c0_i32 = arith.constant 0 : i32
    %c0_i32_0 = arith.constant 0 : i32
    %c0_i32_1 = arith.constant 0 : i32
    %c0_i32_2 = arith.constant 0 : i32
    return %arg0, %c0_i32, %c0_i32_0, %c0_i32_1 : i32, i32, i32, i32
  }
  func.func @transform_3(%arg0: i32) -> (i32, i32, i32) {
    %c0_i32 = arith.constant 0 : i32
    %c0_i32_0 = arith.constant 0 : i32
    %c0_i32_1 = arith.constant 0 : i32
    return %arg0, %c0_i32, %c0_i32_0 : i32, i32, i32
  }
}

</mosaic_0001>

<bundles_post_ra>
// kernel: tpu_custom_call.1
= control target key start
LH: loop header
LB: loop body
LE: loop exit
PB: predicated region body
PF: predicated region fallthrough
CT: control target
= control target key end

     0   :  { %8 = vsyncpa [#allocation3], 0  ;;  %s749_s0 = inlined_call_operand.hbm [shape: f32[2,3,16,16], index: 0, kind: input, shape index: {}]   ;;  %s750_s1 = inlined_call_operand.hbm [shape: f32[2,3,16,16], index: 1, kind: input, shape index: {}]   ;;  %s751_s2 = inlined_call_operand.hbm [shape: f32[2,1,16,16], index: 2, kind: input, shape index: {}]   ;;  %s752_s3 = inlined_call_operand.hbm [shape: f32[1,8,128], index: 3, kind: output, shape index: {}]  }
   0x1   :  { %9 = vsyncpa [#allocation6], 0 }
   0x2   :  { %10 = vsyncpa [#allocation4], 0  ;;  %s28_s14 = sshll.u32 %s750_s1, 4  ;;  %s535_s15 = smov [#allocation5]   ;;  %s29_s14 = int_to_ptr.hbm [resolvable:$true] %s28_s14 }
   0x3   :  { %s30_s16 = sshll.u32 %s535_s15, 4  ;;  %s15_s19 = sshll.u32 %s749_s0, 4  ;;  %s31_s16 = int_to_ptr.vmem [resolvable:$true] %s30_s16  ;;  %s16_s19 = int_to_ptr.hbm [resolvable:$true] %s15_s19 }
   0x4   :  { %s536_s20 = smov 128   ;;  %s537_s21 = smov 8  }
   0x5   :  { %36 = dma.hbm_to_vmem [thread:$0]  %s29_s14, 1536, %s31_s16, [#allocation6], %s536_s20, %s536_s20, %s537_s21  }
   0x6   :  { %s538_s22 = smov [#allocation2]   ;;  %s41_s26 = sshll.u32 %s751_s2, 4  ;;  %s42_s26 = int_to_ptr.hbm [resolvable:$true] %s41_s26 }
   0x7   :  { %s17_s23 = sshll.u32 %s538_s22, 4  ;;  %s539_s1 = smov [#allocation7]   ;;  %s18_s23 = int_to_ptr.vmem [resolvable:$true] %s17_s23 }
   0x8   :  { %23 = dma.hbm_to_vmem [thread:$0]  %s16_s19, 1536, %s18_s23, [#allocation3], %s536_s20, %s536_s20, %s537_s21  }
   0x9   :  { %s43_s27 = sshll.u32 %s539_s1, 4  ;;  %s44_s27 = int_to_ptr.vmem [resolvable:$true] %s43_s27 }
   0xa   :  { %49 = dma.hbm_to_vmem [thread:$0]  %s42_s26, 512, %s44_s27, [#allocation6], %s536_s20, %s536_s20, %s537_s21  }
   0xb   :  { %529 = dma.done.wait [#allocation3], 1536  }
   0xc   :  { %530 = vsyncadd [#allocation3], 4294965760 }
   0xd   :  { %531 = dma.done.wait [#allocation6], 2048  }
   0xe   :  { %532 = vsyncadd [#allocation6], 4294965248  ;;  %v64_v0 = vld [vmem:[#allocation2 + $0x10] sm:$0xff]  ;;  %v62_v2 = vld [vmem:[#allocation2] sm:$0xff]  ;;  %s540_s0 = smov 1   ;;  %s541_s2 = smov 127  }
   0xf   :  { %v76_v1 = vld [vmem:[#allocation5 + $0x10] sm:$0xff]  ;;  %v74_v4 = vld [vmem:[#allocation5] sm:$0xff]  ;;  %v63_v5 = vld [vmem:[#allocation2 + $0x8] sm:$0xff]  ;;  %vm126_vm0 = vcmask 1040384   ;;  %vm175_vm1 = vcmask 1046528   ;;  %vm321_vm2 = vcmask 121856  }
  0x10   :  { %v572_v3 = vsub.f32 %v64_v0, %v76_v1  ;;  %v75_v6 = vld [vmem:[#allocation5 + $0x8] sm:$0xff]  ;;  %v574_v7 = vsub.f32 %v62_v2, %v74_v4  ;;  %v65_v9 = vld [vmem:[#allocation2 + $0x18] sm:$0xff]  ;;  %v66_v12 = vld [vmem:[#allocation2 + $0x20] sm:$0xff]  ;;  %vm260_vm3 = vcmask 7168   ;;  %vm370_vm4 = vcmask 130048   ;;  %s542_s28 = smov [#allocation8]  }
  0x11   :  { %v576_v8 = vsub.f32 %v63_v5, %v75_v6  ;;  %v77_v10 = vld [vmem:[#allocation5 + $0x18] sm:$0xff]  ;;  %v78_v13 = vld [vmem:[#allocation5 + $0x20] sm:$0xff]  ;;  %v67_v15 = vld [vmem:[#allocation2 + $0x28] sm:$0xff]  ;;  %s410_s29 = sshll.u32 %s542_s28, 4  ;;  %s412_s5 = sshll.u32 %s752_s3, 4  ;;  %s411_s29 = int_to_ptr.vmem [resolvable:$true] %s410_s29  ;;  %s413_s5 = int_to_ptr.hbm [resolvable:$true] %s412_s5 }
  0x12   :  { %228 = vrot.lane.b32.xlu1 %v572_v3, %s540_s0  ;;  %224 = vrot.lane.b32.xlu0 %v574_v7, %s540_s0  ;;  %v584_v11 = vsub.f32 %v65_v9, %v77_v10  ;;  %v592_v14 = vsub.f32 %v66_v12, %v78_v13  ;;  %v79_v16 = vld [vmem:[#allocation5 + $0x28] sm:$0xff]  ;;  %v68_v17 = vld [vmem:[#allocation2 + $0x30] sm:$0xff]  ;;  %v69_v21 = vld [vmem:[#allocation2 + $0x38] sm:$0xff]  ;;  %v130_v44 = vrot.slane %v572_v3, 7  ;;  %v127_v45 = vrot.slane %v574_v7, 7 }
  0x13   :  { %287 = vrot.lane.b32.xlu2 %v576_v8, %s541_s2  ;;  %v80_v18 = vld [vmem:[#allocation5 + $0x30] sm:$0xff]  ;;  %v600_v19 = vsub.f32 %v67_v15, %v79_v16  ;;  %v81_v22 = vld [vmem:[#allocation5 + $0x38] sm:$0xff]  ;;  %v70_v24 = vld [vmem:[#allocation2 + $0x40] sm:$0xff]  ;;  %v128_v41 = vrot.slane %v576_v8, 7  ;;  %v103_v47 = vmul.f32 -4.0, %v576_v8  ;;  %v104_v51 = vmul.f32 -4.0, %v572_v3 }
  0x14   :  { %v602_v20 = vsub.f32 %v68_v17, %v80_v18  ;;  %v610_v23 = vsub.f32 %v69_v21, %v81_v22  ;;  %v82_v25 = vld [vmem:[#allocation5 + $0x40] sm:$0xff]  ;;  %v71_v26 = vld [vmem:[#allocation2 + $0x48] sm:$0xff]  ;;  %v72_v30 = vld [vmem:[#allocation2 + $0x50] sm:$0xff]  ;;  %v131_v42 = vrot.slane %v584_v11, 7  ;;  %v105_v48 = vmul.f32 -4.0, %v584_v11 }
  0x15   :  { %v83_v27 = vld [vmem:[#allocation5 + $0x48] sm:$0xff]  ;;  %v618_v28 = vsub.f32 %v70_v24, %v82_v25  ;;  %v84_v31 = vld [vmem:[#allocation5 + $0x50] sm:$0xff]  ;;  %v73_v33 = vld [vmem:[#allocation2 + $0x58] sm:$0xff]  ;;  %v129_v49 = vsel %vm126_vm0, %v127_v45, %v128_v41  ;;  %v180_v50 = vrot.slane %v584_v11, 1  ;;  %v102_v52 = vmul.f32 -4.0, %v574_v7 }
  0x16   :  { %v620_v29 = vsub.f32 %v71_v26, %v83_v27  ;;  %v628_v32 = vsub.f32 %v72_v30, %v84_v31  ;;  %v85_v34 = vld [vmem:[#allocation5 + $0x58] sm:$0xff]  ;;  %v132_v53 = vsel %vm126_vm0, %v130_v44, %v131_v42  ;;  %v158_v54 = vsel %vm126_vm0, 0.0, %v130_v44 }
  0x17   :  { %v636_v35 = vsub.f32 %v73_v33, %v85_v34  ;;  %v179_v55 = vrot.slane %v572_v3, 1  ;;  %v177_v56 = vrot.slane %v576_v8, 1  ;;  %v176_v57 = vrot.slane %v574_v7, 1 }
  0x18   :  { %v157_v58 = vsel %vm126_vm0, 0.0, %v127_v45  ;;  %v164_v59 = vadd.f32 %v129_v49, %v103_v47  ;;  %v166_v61 = vadd.f32 %v132_v53, %v105_v48  ;;  %v133_v63 = vrot.slane %v592_v14, 7 }
  0x19   :  { %v206_v62 = vsel %vm175_vm1, %v177_v56, 0.0  ;;  %v165_v0 = vadd.f32 %v158_v54, %v104_v51  ;;  %v207_v1 = vsel %vm175_vm1, %v180_v50, 0.0  ;;  %v163_v4 = vadd.f32 %v157_v58, %v102_v52  ;;  %v99_v52 = vld [vmem:[#allocation7 + $0x8] sm:$0xff] }
  0x1a   :  { %285 = vrot.lane.b32.xlu1 %v574_v7, %s541_s2  ;;  %226 = vrot.lane.b32.xlu0 %v576_v8, %s540_s0  ;;  %v178_v5 = vsel %vm175_vm1, %v176_v57, %v177_v56  ;;  %v134_v7 = vrot.slane %v600_v19, 7  ;;  %v213_v8 = vadd.f32 %v206_v62, %v164_v59  ;;  %v106_v9 = vmul.f32 -4.0, %v592_v14 }
  0x1b   :  { %230 = vrot.lane.b32.xlu2 %v584_v11, %s540_s0  ;;  %v182_v10 = vrot.slane %v592_v14, 1  ;;  %v215_v12 = vadd.f32 %v207_v1, %v166_v61  ;;  %v159_v15 = vsel %vm126_vm0, 0.0, %v133_v63  ;;  %v136_v17 = vrot.slane %v602_v20, 7 }
  0x1c   :  { %v107_v18 = vmul.f32 -4.0, %v600_v19  ;;  %v212_v24 = vadd.f32 %v178_v5, %v163_v4  ;;  %v135_v25 = vsel %vm126_vm0, %v133_v63, %v134_v7  ;;  %v167_v26 = vadd.f32 %v159_v15, %v106_v9 }
  0x1d   :  { %v137_v30 = vrot.slane %v610_v23, 7  ;;  %v186_v41 = vrot.slane %v610_v23, 1  ;;  %v109_v48 = vmul.f32 -4.0, %v610_v23  ;;  %v140_v4 = vrot.slane %v620_v29, 7 }
  0x1e   :  { %v168_v44 = vadd.f32 %v135_v25, %v107_v18  ;;  %v139_v9 = vrot.slane %v618_v28, 7  ;;  %v110_v25 = vmul.f32 -4.0, %v618_v28 }
  0x1f   :  { %v209_v63 = vsel %vm175_vm1, %v186_v41, 0.0 }
  0x22   :  { %232 = vrot.lane.b32.xlu1 %v592_v14, %s540_s0  ;;  %289 = vrot.lane.b32.xlu0 %v572_v3, %s541_s2  ;;  %v181_v3 = vsel %vm175_vm1, %v179_v55, %v180_v50 }
  0x23   :  { %291 = vrot.lane.b32.xlu2 %v584_v11, %s541_s2  ;;  %v183_v11 = vrot.slane %v600_v19, 1  ;;  %v214_v22 = vadd.f32 %v181_v3, %v165_v0 }
  0x25   :  { %v184_v27 = vsel %vm175_vm1, %v182_v10, %v183_v11  ;;  %v208_v54 = vsel %vm175_vm1, %v183_v11, 0.0 }
  0x26   :  { %v216_v56 = vadd.f32 %v184_v27, %v167_v26  ;;  %v217_v62 = vadd.f32 %v208_v54, %v168_v44 }
  0x2a   :  { %293 = vrot.lane.b32.xlu1 %v592_v14, %s541_s2  ;;  %234 = vrot.lane.b32.xlu0 %v600_v19, %s540_s0 }
  0x2b   :  { %236 = vrot.lane.b32.xlu2 %v602_v20, %s540_s0 }
  0x32   :  { %238 = vrot.lane.b32.xlu1 %v610_v23, %s540_s0  ;;  %295 = vrot.lane.b32.xlu0 %v600_v19, %s541_s2  ;;  %v160_v19 = vsel %vm126_vm0, 0.0, %v136_v17 }
  0x33   :  { %297 = vrot.lane.b32.xlu2 %v602_v20, %s541_s2 }
  0x3a   :  { %299 = vrot.lane.b32.xlu1 %v610_v23, %s541_s2  ;;  %240 = vrot.lane.b32.xlu0 %v618_v28, %s540_s0 }
  0x3b   :  { %242 = vrot.lane.b32.xlu2 %v620_v29, %s540_s0 }
  0x42   :  { %244 = vrot.lane.b32.xlu1 %v628_v32, %s540_s0  ;;  %301 = vrot.lane.b32.xlu0 %v618_v28, %s541_s2 }
  0x43   :  { %303 = vrot.lane.b32.xlu2 %v620_v29, %s541_s2 }
  0x4a   :  { %305 = vrot.lane.b32.xlu1 %v628_v32, %s541_s2  ;;  %246 = vrot.lane.b32.xlu0 %v636_v35, %s540_s0 }
  0x4b   :  { %307 = vrot.lane.b32.xlu2 %v636_v35, %s541_s2 }
  0x6d   :  { %v288_v36 = vpop.permute.xlu2 %287 }
  0x6e   :  { %v323_v21 = vsel %vm321_vm2, %v288_v36, 0.0  ;;  %v185_v36 = vrot.slane %v602_v20, 1 }
  0x70   :  { %v187_v57 = vsel %vm175_vm1, %v185_v36, %v186_v41 }
  0x75   :  { %v231_v37 = vpop.permute.xlu2 %230 }
  0x76   :  { %v264_v16 = vsel %vm260_vm3, 0.0, %v231_v37  ;;  %v108_v37 = vmul.f32 -4.0, %v602_v20  ;;  %v138_v20 = vsel %vm126_vm0, %v136_v17, %v137_v30  ;;  %v161_v30 = vsel %vm126_vm0, 0.0, %v139_v9 }
  0x77   :  { %v276_v34 = vadd.f32 %v264_v16, %v215_v12  ;;  %v170_v61 = vadd.f32 %v138_v20, %v109_v48 }
  0x78   :  { %v169_v53 = vadd.f32 %v160_v19, %v108_v37 }
  0x79   :  { %v219_v11 = vadd.f32 %v209_v63, %v170_v61  ;;  %v112_v61 = vmul.f32 -4.0, %v628_v32 }
  0x7a   :  { %v218_v0 = vadd.f32 %v187_v57, %v169_v53  ;;  %v100_v53 = vld [vmem:[#allocation7 + $0x10] sm:$0xff] }
  0x7d   :  { %v644_v40 = vpop.permute.xlu2 %291 }
  0x7e   :  { %v325_v47 = vsel %vm321_vm2, %v644_v40, 0.0  ;;  %v98_v40 = vld [vmem:[#allocation7] sm:$0xff] }
  0x7f   :  { %v337_v58 = vadd.f32 %v325_v47, %v276_v34 }
  0x81   :  { %v349_v10 = vmul.f32 %v337_v58, %v99_v52 }
  0x84   :  { %v229_v38 = vpop.permute.xlu1 %228  ;;  %v225_v39 = vpop.permute.xlu0 %224 }
  0x85   :  { %v662_v60 = vpop.permute.xlu2 %236  ;;  %v263_v31 = vsel %vm260_vm3, 0.0, %v229_v38  ;;  %v261_v33 = vsel %vm260_vm3, 0.0, %v225_v39 }
  0x86   :  { %v275_v49 = vadd.f32 %v263_v31, %v214_v22  ;;  %v273_v50 = vadd.f32 %v261_v33, %v212_v24  ;;  %v141_v22 = vsel %vm126_vm0, %v139_v9, %v140_v4  ;;  %v189_v24 = vrot.slane %v620_v29, 1 }
  0x87   :  { %v113_v9 = vmul.f32 -4.0, %v636_v35 }
  0x88   :  { %v210_v41 = vsel %vm175_vm1, %v189_v24, 0.0 }
  0x8c   :  { %v286_v43 = vpop.permute.xlu1 %285  ;;  %v227_v46 = vpop.permute.xlu0 %226 }
  0x8d   :  { %v262_v13 = vsel %vm260_vm3, 0.0, %v227_v46  ;;  %v298_v45 = vpop.permute.xlu2 %297  ;;  %v322_v46 = vsel %vm321_vm2, %v286_v43, 0.0 }
  0x8e   :  { %v274_v14 = vadd.f32 %v262_v13, %v213_v8  ;;  %v334_v55 = vadd.f32 %v322_v46, %v273_v50  ;;  %v111_v13 = vmul.f32 -4.0, %v620_v29  ;;  %v328_v19 = vsel %vm321_vm2, %v298_v45, 0.0 }
  0x8f   :  { %v361_v29 = vand.u32 2147483647, %v349_v10  ;;  %v142_v45 = vrot.slane %v628_v32, 7 }
  0x90   :  { %v335_v51 = vadd.f32 %v323_v21, %v274_v14  ;;  %v346_v5 = vmul.f32 %v334_v55, %v98_v40  ;;  %v188_v14 = vrot.slane %v618_v28, 1  ;;  %v172_v36 = vadd.f32 %v141_v22, %v111_v13 }
  0x91   :  { %v162_v63 = vsel %vm126_vm0, 0.0, %v142_v45 }
  0x92   :  { %v347_v23 = vmul.f32 %v335_v51, %v99_v52  ;;  %v358_v26 = vand.u32 2147483647, %v346_v5  ;;  %v190_v28 = vsel %vm175_vm1, %v188_v14, %v189_v24  ;;  %v221_v54 = vadd.f32 %v210_v41, %v172_v36 }
  0x94   :  { %v233_v2 = vpop.permute.xlu1 %232  ;;  %v290_v6 = vpop.permute.xlu0 %289  ;;  %v359_v15 = vand.u32 2147483647, %v347_v23  ;;  %v371_v44 = vsel %vm370_vm4, %v358_v26, 0.0  ;;  %v143_v23 = vrot.slane %v636_v35, 7 }
  0x95   :  { %v324_v38 = vsel %vm321_vm2, %v290_v6, 0.0  ;;  %v265_v59 = vsel %vm260_vm3, 0.0, %v233_v2  ;;  %v267_v2 = vsel %vm260_vm3, 0.0, %v662_v60  ;;  %v243_v21 = vpop.permute.xlu2 %242 }
  0x96   :  { %v336_v43 = vadd.f32 %v324_v38, %v275_v49  ;;  %v277_v6 = vadd.f32 %v265_v59, %v216_v56  ;;  %v279_v31 = vadd.f32 %v267_v2, %v218_v0  ;;  %v372_v34 = vsel %vm370_vm4, %v359_v15, 0.0 }
  0x97   :  { %v373_v48 = vadd.f32 %v372_v34, %v371_v44  ;;  %v376_v56 = vsel %vm370_vm4, %v361_v29, 0.0  ;;  %v270_v57 = vsel %vm260_vm3, 0.0, %v243_v21  ;;  %v191_v0 = vrot.slane %v628_v32, 1 }
  0x98   :  { %v348_v7 = vmul.f32 %v336_v43, %v98_v40  ;;  %v340_v49 = vadd.f32 %v328_v19, %v279_v31  ;;  %v282_v4 = vadd.f32 %v270_v57, %v221_v54  ;;  %v173_v2 = vadd.f32 %v162_v63, %v112_v61 }
  0x9a   :  { %v360_v60 = vand.u32 2147483647, %v348_v7 }
  0x9c   :  { %v294_v42 = vpop.permute.xlu1 %293  ;;  %v235_v39 = vpop.permute.xlu0 %234  ;;  %v374_v46 = vsel %vm370_vm4, %v360_v60, 0.0 }
  0x9d   :  { %v326_v1 = vsel %vm321_vm2, %v294_v42, 0.0  ;;  %v266_v3 = vsel %vm260_vm3, 0.0, %v235_v39  ;;  %v171_v42 = vadd.f32 %v161_v30, %v110_v25  ;;  %v375_v43 = vadd.f32 %v374_v46, %v373_v48  ;;  %v304_v59 = vpop.permute.xlu2 %303 }
  0x9e   :  { %v338_v16 = vadd.f32 %v326_v1, %v277_v6  ;;  %v278_v17 = vadd.f32 %v266_v3, %v217_v62  ;;  %v352_v62 = vmul.f32 %v340_v49, %v100_v53  ;;  %v192_v1 = vrot.slane %v636_v35, 1 }
  0x9f   :  { %v377_v7 = vadd.f32 %v376_v56, %v375_v43 }
  0xa0   :  { %v350_v37 = vmul.f32 %v338_v16, %v98_v40  ;;  %v101_v40 = vld [vmem:[#allocation7 + $0x18] sm:$0xff]  ;;  %v193_v15 = vsel %vm175_vm1, %v191_v0, %v192_v1  ;;  %v211_v26 = vsel %vm175_vm1, %v192_v1, 0.0 }
  0xa1   :  { %v222_v35 = vadd.f32 %v193_v15, %v173_v2 }
  0xa2   :  { %v362_v20 = vand.u32 2147483647, %v350_v37 }
  0xa4   :  { %v239_v8 = vpop.permute.xlu1 %238  ;;  %v296_v12 = vpop.permute.xlu0 %295  ;;  %v378_v3 = vsel %vm370_vm4, %v362_v20, 0.0 }
  0xa5   :  { %v327_v18 = vsel %vm321_vm2, %v296_v12, 0.0  ;;  %v268_v33 = vsel %vm260_vm3, 0.0, %v239_v8  ;;  %v331_v8 = vsel %vm321_vm2, %v304_v59, 0.0  ;;  %v144_v12 = vsel %vm126_vm0, %v142_v45, %v143_v23  ;;  %v308_v36 = vpop.permute.xlu2 %307 }
  0xa6   :  { %v339_v27 = vadd.f32 %v327_v18, %v278_v17  ;;  %v280_v47 = vadd.f32 %v268_v33, %v219_v11  ;;  %v379_v32 = vadd.f32 %v378_v3, %v377_v7  ;;  %v364_v17 = vand.u32 2147483647, %v352_v62 }
  0xa7   :  { %v343_v21 = vadd.f32 %v331_v8, %v282_v4  ;;  %v174_v14 = vadd.f32 %v144_v12, %v113_v9  ;;  %v333_v48 = vsel %vm321_vm2, %v308_v36, 0.0 }
  0xa8   :  { %v351_v38 = vmul.f32 %v339_v27, %v99_v52  ;;  %v220_v52 = vadd.f32 %v190_v28, %v171_v42  ;;  %v382_v30 = vsel %vm370_vm4, %v364_v17, 0.0 }
  0xa9   :  { %v355_v33 = vmul.f32 %v343_v21, %v101_v40  ;;  %v223_v19 = vadd.f32 %v211_v26, %v174_v14 }
  0xaa   :  { %v363_v58 = vand.u32 2147483647, %v351_v38 }
  0xac   :  { %v300_v39 = vpop.permute.xlu1 %299  ;;  %v241_v51 = vpop.permute.xlu0 %240  ;;  %v380_v10 = vsel %vm370_vm4, %v363_v58, 0.0 }
  0xad   :  { %v329_v50 = vsel %vm321_vm2, %v300_v39, 0.0  ;;  %v269_v6 = vsel %vm260_vm3, 0.0, %v241_v51  ;;  %v381_v24 = vadd.f32 %v380_v10, %v379_v32 }
  0xae   :  { %v341_v55 = vadd.f32 %v329_v50, %v280_v47  ;;  %v281_v13 = vadd.f32 %v269_v6, %v220_v52  ;;  %v367_v47 = vand.u32 2147483647, %v355_v33 }
  0xaf   :  { %v383_v34 = vadd.f32 %v382_v30, %v381_v24 }
  0xb0   :  { %v353_v5 = vmul.f32 %v341_v55, %v101_v40  ;;  %v388_v20 = vsel %vm370_vm4, %v367_v47, 0.0 }
  0xb2   :  { %v365_v18 = vand.u32 2147483647, %v353_v5 }
  0xb4   :  { %v245_v11 = vpop.permute.xlu1 %244  ;;  %v302_v16 = vpop.permute.xlu0 %301  ;;  %v384_v31 = vsel %vm370_vm4, %v365_v18, 0.0 }
  0xb5   :  { %v330_v22 = vsel %vm321_vm2, %v302_v16, 0.0  ;;  %v271_v60 = vsel %vm260_vm3, 0.0, %v245_v11  ;;  %v385_v42 = vadd.f32 %v384_v31, %v383_v34 }
  0xb6   :  { %v342_v25 = vadd.f32 %v330_v22, %v281_v13  ;;  %v283_v29 = vadd.f32 %v271_v60, %v222_v35 }
  0xb8   :  { %v354_v27 = vmul.f32 %v342_v25, %v100_v53 }
  0xba   :  { %v366_v37 = vand.u32 2147483647, %v354_v27 }
  0xbc   :  { %v306_v41 = vpop.permute.xlu1 %305  ;;  %v386_v28 = vsel %vm370_vm4, %v366_v37, 0.0  ;;  %v247_v46 = vpop.permute.xlu0 %246 }
  0xbd   :  { %v332_v44 = vsel %vm321_vm2, %v306_v41, 0.0  ;;  %v272_v39 = vsel %vm260_vm3, 0.0, %v247_v46  ;;  %v387_v49 = vadd.f32 %v386_v28, %v385_v42 }
  0xbe   :  { %v344_v38 = vadd.f32 %v332_v44, %v283_v29  ;;  %v284_v50 = vadd.f32 %v272_v39, %v223_v19 }
  0xbf   :  { %v389_v56 = vadd.f32 %v388_v20, %v387_v49 }
  0xc0   :  { %v356_v51 = vmul.f32 %v344_v38, %v100_v53  ;;  %v345_v45 = vadd.f32 %v333_v48, %v284_v50 }
  0xc2   :  { %v368_v54 = vand.u32 2147483647, %v356_v51  ;;  %v357_v55 = vmul.f32 %v345_v45, %v101_v40 }
  0xc4   :  { %v390_v43 = vsel %vm370_vm4, %v368_v54, 0.0  ;;  %v369_v57 = vand.u32 2147483647, %v357_v55 }
  0xc5   :  { %v391_v58 = vadd.f32 %v390_v43, %v389_v56 }
  0xc6   :  { %v392_v52 = vsel %vm370_vm4, %v369_v57, 0.0 }
  0xc7   :  { %v393_v59 = vadd.f32 %v392_v52, %v391_v58 }
  0xc9   :  { %394 = vadd.xlane.f32.xlu0 %v393_v59 }
 0x13c   :  { %v395_v61 = vpop.xlane.xlu0 %394 }
 0x13d   :  { %v396_v23 = vrot.slane %v395_v61, 4 }
 0x13f   :  { %v397_v62 = vadd.f32 %v396_v23, %v395_v61 }
 0x141   :  { %v398_v63 = vrot.slane %v397_v62, 2 }
 0x143   :  { %v399_v0 = vadd.f32 %v398_v63, %v397_v62 }
 0x145   :  { %v400_v53 = vrot.slane %v399_v0, 1 }
 0x147   :  { %v401_v1 = vadd.f32 %v400_v53, %v399_v0 }
 0x149   :  { %423 = vpush %v401_v1 }
 0x17a   :  { %s424_s6 = spop %423 }
 0x17b   :  { %v403_v40 = vstv %s424_s6 }
 0x17c   :  { %404 = vst [vmem:[#allocation8] sm:$0xff] %v403_v40 }
 0x17d   :  { %415 = dma.vmem_to_hbm [thread:$0]  %s411_s29, 128, %s413_s5, [#allocation4]  }
 0x17e   :  { %533 = dma.done.wait [#allocation4], 128  }
 0x17f   :  { %534 = vsyncadd [#allocation4], 4294967168 }
 0x180   :  { %420 = vsyncpa [#allocation3], 1 }
 0x181   :  { %421 = vsyncpa [#allocation6], 1 }
 0x182   :  { %422 = vsyncpa [#allocation4], 1 }

</bundles_post_ra>
